<compile_context>
chip_gen: v6e
topology: v6e:2x2x1
jax: 0.10.0
libtpu: 0.0.40
codegen_flags: <defaults>
</compile_context>

<pallas_src>
import jax
import jax.numpy as jnp
from jax import lax
from jax.experimental import pallas as pl
from jax.experimental.pallas import tpu as pltpu


def _round_up(x, m):
    return (x + m - 1) // m * m


def _const_spec(shape):
    """VMEM-resident block (constant index_map). Single-buffered when the
    running jax supports pipeline_mode: these blocks never change across grid
    steps, so double-buffering them only wastes VMEM."""
    nd = len(shape)
    try:
        return pl.BlockSpec(shape, lambda i: (0,) * nd,
                            pipeline_mode=pl.Buffered(1))
    except TypeError:  # older jax without pipeline_mode kwarg
        return pl.BlockSpec(shape, lambda i: (0,) * nd)


def _attdec_math(feat_ref, w1_ref, b1_ref, w3_ref, b3_ref):
    # feat arrives in its original dtype (f32); cast to bf16 in-kernel — cheap
    # VALU work hidden under the MXU, avoids a wrapper-side cast pass.
    feat = feat_ref[...].astype(jnp.bfloat16)

    # fc1: bf16 MXU matmul, f32 accumulate; bias + LeakyReLU(0.2) in f32.
    h = jnp.dot(feat, w1_ref[...], preferred_element_type=jnp.float32)
    h = h + b1_ref[...]                       # b1 is (1, ngh_p), broadcasts
    h = jnp.where(h > 0.0, h, 0.2 * h)

    # fc3: bf16 MXU matmul, f32 accumulate; bias in f32.
    o = jnp.dot(h.astype(jnp.bfloat16), w3_ref[...],
                preferred_element_type=jnp.float32)
    o = o + b3_ref[...]                       # b3 is (1, att_p)

    # Row-wise L2 normalization; rsqrt runs on the EUP (own VLIW slot).
    # No epsilon — parity with the PyTorch divide (all-zero row -> inf/nan).
    # Padded att columns are exactly zero (zero-padded w3/b3) so the sum is exact.
    inv = lax.rsqrt(jnp.sum(o * o, axis=-1, keepdims=True))
    return o * inv, h


def attdec_kernel(feat_ref, w1_ref, b1_ref, w3_ref, b3_ref, out_ref):
    out, _ = _attdec_math(feat_ref, w1_ref, b1_ref, w3_ref, b3_ref)
    out_ref[...] = out


def attdec_kernel_hidden(feat_ref, w1_ref, b1_ref, w3_ref, b3_ref,
                         out_ref, hid_ref):
    out, h = _attdec_math(feat_ref, w1_ref, b1_ref, w3_ref, b3_ref)
    out_ref[...] = out
    hid_ref[...] = h.astype(hid_ref.dtype)    # == self.hidden (getLayersOutDet)


def prepare_params(w1, b1, w3, b3):
    """Cast + zero-pad the AttDec parameters ONCE (at init / after a parameter
    update), so each forward call does not pay an HBM cast/pad pass.

    w1: [resSize, ngh]; b1: [ngh]; w3: [ngh, attSize]; b3: [attSize]
    (weights stored pre-transposed as [in_features, out_features]).
    """
    res, ngh = w1.shape
    ngh2, att = w3.shape
    assert ngh2 == ngh
    res_p = _round_up(res, 128)
    ngh_p = _round_up(ngh, 128)
    att_p = _round_up(att, 128)

    # Zero padding keeps the math exact (zero rows/cols contribute nothing,
    # including to the L2-norm sum).
    w1_p = jnp.pad(w1.astype(jnp.bfloat16), ((0, res_p - res), (0, ngh_p - ngh)))
    w3_p = jnp.pad(w3.astype(jnp.bfloat16), ((0, ngh_p - ngh), (0, att_p - att)))
    b1_p = jnp.pad(b1.astype(jnp.float32), (0, ngh_p - ngh)).reshape(1, ngh_p)
    b3_p = jnp.pad(b3.astype(jnp.float32), (0, att_p - att)).reshape(1, att_p)

    dims = dict(res=res, ngh=ngh, att=att, res_p=res_p, ngh_p=ngh_p, att_p=att_p)
    return (w1_p, b1_p, w3_p, b3_p), dims


def attdec_forward(feat, params, dims, *, return_hidden=False, block_b=256,
                   hidden_dtype=jnp.bfloat16):
    """feat: [B, resSize]; params/dims from prepare_params().
    Returns out [B, attSize] f32 (and hidden [B, ngh] if return_hidden)."""
    w1_p, b1_p, w3_p, b3_p = params
    B, res = feat.shape
    assert res == dims["res"]
    res_p, ngh_p, att_p = dims["res_p"], dims["ngh_p"], dims["att_p"]
    ngh, att = dims["ngh"], dims["att"]

    # Batch tile: multiple of 8, and capped so the 'parallel' batch grid has
    # >= 2 (even) steps whenever B allows it -> both v7x TensorCores get work.
    tb = min(block_b, _round_up(max(-(-B // 2), 8), 8))
    b_p = _round_up(B, tb)

    # feat stays f32; only pad if shapes demand it (bf16 cast happens in-kernel).
    if b_p != B or res_p != res:
        feat_in = jnp.pad(feat, ((0, b_p - B), (0, res_p - res)))
    else:
        feat_in = feat
    feat_isize = jnp.dtype(feat_in.dtype).itemsize
    hid_isize = jnp.dtype(hidden_dtype).itemsize

    grid = (b_p // tb,)
    in_specs = [
        pl.BlockSpec((tb, res_p), lambda i: (i, 0)),  # feat: batch-tiled
        _const_spec((res_p, ngh_p)),                  # w1: resident, 1-buffered
        _const_spec((1, ngh_p)),                      # b1
        _const_spec((ngh_p, att_p)),                  # w3
        _const_spec((1, att_p)),                      # b3
    ]
    out_spec = pl.BlockSpec((tb, att_p), lambda i: (i, 0))

    # VMEM budget: single-buffered resident weights + double-buffered batch
    # tiles + the in-kernel f32 intermediate h and its bf16 copy (+ headroom),
    # clamped to 0.75x of this generation's physical VMEM.
    weight_bytes = (res_p * ngh_p + ngh_p * att_p) * 2 + (ngh_p + att_p) * 4
    tile_bytes = tb * (res_p * feat_isize + att_p * 4
                       + (ngh_p * hid_isize if return_hidden else 0))
    h_scratch = tb * ngh_p * (4 + 2)
    budget = weight_bytes + 2 * tile_bytes + h_scratch + (4 << 20)
    try:
        cap = pltpu.get_tpu_info().vmem_capacity_bytes
    except Exception:
        cap = 64 << 20  # conservative (v7x) fallback
    vmem_limit = int(min(max(budget, 32 << 20), int(0.75 * cap)))

    compiler_params = pltpu.CompilerParams(
        dimension_semantics=("parallel",),   # shard batch across TCs on v7x
        vmem_limit_bytes=vmem_limit,
    )

    flops = 2 * b_p * (res_p * ngh_p + ngh_p * att_p)
    bytes_accessed = (b_p * res_p * feat_isize + weight_bytes + b_p * att_p * 4
                      + (b_p * ngh_p * hid_isize if return_hidden else 0))
    cost = pl.CostEstimate(flops=flops, transcendentals=b_p,
                           bytes_accessed=bytes_accessed)

    if return_hidden:
        out_p, hid_p = pl.pallas_call(
            attdec_kernel_hidden,
            grid=grid,
            out_shape=(
                jax.ShapeDtypeStruct((b_p, att_p), jnp.float32),
                jax.ShapeDtypeStruct((b_p, ngh_p), hidden_dtype),
            ),
            in_specs=in_specs,
            out_specs=(out_spec, pl.BlockSpec((tb, ngh_p), lambda i: (i, 0))),
            compiler_params=compiler_params,
            cost_estimate=cost,
        )(feat_in, w1_p, b1_p, w3_p, b3_p)
        return out_p[:B, :att], hid_p[:B, :ngh]

    out_p = pl.pallas_call(
        attdec_kernel,
        grid=grid,
        out_shape=jax.ShapeDtypeStruct((b_p, att_p), jnp.float32),
        in_specs=in_specs,
        out_specs=out_spec,
        compiler_params=compiler_params,
        cost_estimate=cost,
    )(feat_in, w1_p, b1_p, w3_p, b3_p)
    return out_p[:B, :att]


def init_params(key, res_size, ngh, att_size):
    """weights_init: Linear weight ~ N(0, 0.02), bias = 0. Stored as [in, out]."""
    k1, k2 = jax.random.split(key)
    w1 = (0.02 * jax.random.normal(k1, (res_size, ngh))).astype(jnp.float32)
    b1 = jnp.zeros((ngh,), jnp.float32)
    w3 = (0.02 * jax.random.normal(k2, (ngh, att_size))).astype(jnp.float32)
    b3 = jnp.zeros((att_size,), jnp.float32)
    return w1, b1, w3, b3


if __name__ == "__main__":
    key = jax.random.PRNGKey(0)
    kx, kp = jax.random.split(key)

    # Small shapes consistent with the module: opt.resSize=32, opt.ngh=64, attSize=16
    B, res_size, ngh, att_size = 8, 32, 64, 16

    feat = jax.random.normal(kx, (B, res_size), dtype=jnp.float32)
    w1, b1, w3, b3 = init_params(kp, res_size, ngh, att_size)

    # One-time cast/pad of the parameters (cached across forward calls).
    params, dims = prepare_params(w1, b1, w3, b3)

    out, hidden = attdec_forward(feat, params, dims, return_hidden=True)
    out_only = attdec_forward(feat, params, dims, return_hidden=False)
    jax.block_until_ready((out, hidden, out_only))

    # f32 reference (same math as the PyTorch forward). The kernel runs bf16
    # MXU matmuls with f32 accumulation (hidden emitted in bf16), so use
    # bf16-appropriate tolerances.
    h_ref = feat @ w1 + b1
    h_ref = jnp.where(h_ref > 0, h_ref, 0.2 * h_ref)
    o_ref = h_ref @ w3 + b3
    o_ref = o_ref / jnp.sqrt(jnp.sum(o_ref**2, axis=1, keepdims=True))

    assert out.shape == (B, att_size) and hidden.shape == (B, ngh)
    assert jnp.allclose(out, o_ref, atol=2e-2, rtol=2e-2)
    assert jnp.allclose(hidden.astype(jnp.float32), h_ref, atol=1e-2, rtol=2e-2)
    assert jnp.allclose(out_only, out, atol=1e-6, rtol=1e-6)

    print("KERNEL_OK")
</pallas_src>

<mosaic_0001>
module attributes {stable_mosaic.version = 11 : i64} {
  func.func @attdec_kernel_hidden(%arg0: i32, %arg1: memref<8x128xf32, #tpu.memory_space<vmem>>, %arg2: memref<128x128xbf16, #tpu.memory_space<vmem>>, %arg3: memref<1x128xf32, #tpu.memory_space<vmem>>, %arg4: memref<128x128xbf16, #tpu.memory_space<vmem>>, %arg5: memref<1x128xf32, #tpu.memory_space<vmem>>, %arg6: memref<8x128xf32, #tpu.memory_space<vmem>>, %arg7: memref<8x128xbf16, #tpu.memory_space<vmem>>) attributes {dimension_semantics = [#tpu.dimension_semantics<parallel>], iteration_bounds = array<i64: 1>, scalar_prefetch = 0 : i64, scratch_operands = 0 : i64, tpu.core_type = #tpu.core_type<tc>, window_params = [{transform_indices = @transform_0, window_bounds = array<i64: 8, 128>}, {pipeline_mode = #tpu.pipeline_mode<synchronous>, transform_indices = @transform_1, window_bounds = array<i64: 128, 128>}, {pipeline_mode = #tpu.pipeline_mode<synchronous>, transform_indices = @transform_2, window_bounds = array<i64: 1, 128>}, {pipeline_mode = #tpu.pipeline_mode<synchronous>, transform_indices = @transform_3, window_bounds = array<i64: 128, 128>}, {pipeline_mode = #tpu.pipeline_mode<synchronous>, transform_indices = @transform_4, window_bounds = array<i64: 1, 128>}, {transform_indices = @transform_5, window_bounds = array<i64: 8, 128>}, {transform_indices = @transform_6, window_bounds = array<i64: 8, 128>}]} {
    %c0 = arith.constant 0 : index
    %c0_0 = arith.constant 0 : index
    %0 = vector.load %arg1[%c0, %c0_0] : memref<8x128xf32, #tpu.memory_space<vmem>>, vector<8x128xf32>
    %1 = arith.truncf %0 : vector<8x128xf32> to vector<8x128xbf16>
    %c0_1 = arith.constant 0 : index
    %c0_2 = arith.constant 0 : index
    %2 = vector.load %arg2[%c0_1, %c0_2] : memref<128x128xbf16, #tpu.memory_space<vmem>>, vector<128x128xbf16>
    %cst = arith.constant dense<0.000000e+00> : vector<8x128xf32>
    %3 = tpu.matmul %1, %2, %cst {dimension_numbers = #tpu.dot_dimension_numbers<[1], [0], [0], [1], [0, 0, 1, 1], [], []>} : vector<8x128xbf16>, vector<128x128xbf16>, vector<8x128xf32> -> vector<8x128xf32>
    %c0_3 = arith.constant 0 : index
    %c0_4 = arith.constant 0 : index
    %4 = vector.load %arg3[%c0_3, %c0_4] : memref<1x128xf32, #tpu.memory_space<vmem>>, vector<1x128xf32>
    %5 = vector.broadcast %4 : vector<1x128xf32> to vector<8x128xf32>
    %6 = arith.addf %3, %5 : vector<8x128xf32>
    %cst_5 = arith.constant 0.000000e+00 : f32
    %7 = vector.broadcast %cst_5 : f32 to vector<8x128xf32>
    %8 = arith.cmpf ogt, %6, %7 : vector<8x128xf32>
    %cst_6 = arith.constant 2.000000e-01 : f32
    %9 = vector.broadcast %cst_6 : f32 to vector<8x128xf32>
    %10 = arith.mulf %9, %6 : vector<8x128xf32>
    %11 = arith.select %8, %6, %10 : vector<8x128xi1>, vector<8x128xf32>
    %12 = arith.truncf %11 : vector<8x128xf32> to vector<8x128xbf16>
    %c0_7 = arith.constant 0 : index
    %c0_8 = arith.constant 0 : index
    %13 = vector.load %arg4[%c0_7, %c0_8] : memref<128x128xbf16, #tpu.memory_space<vmem>>, vector<128x128xbf16>
    %cst_9 = arith.constant dense<0.000000e+00> : vector<8x128xf32>
    %14 = tpu.matmul %12, %13, %cst_9 {dimension_numbers = #tpu.dot_dimension_numbers<[1], [0], [0], [1], [0, 0, 1, 1], [], []>} : vector<8x128xbf16>, vector<128x128xbf16>, vector<8x128xf32> -> vector<8x128xf32>
    %c0_10 = arith.constant 0 : index
    %c0_11 = arith.constant 0 : index
    %15 = vector.load %arg5[%c0_10, %c0_11] : memref<1x128xf32, #tpu.memory_space<vmem>>, vector<1x128xf32>
    %16 = vector.broadcast %15 : vector<1x128xf32> to vector<8x128xf32>
    %17 = arith.addf %14, %16 : vector<8x128xf32>
    %18 = arith.mulf %17, %17 : vector<8x128xf32>
    %cst_12 = arith.constant dense<0.000000e+00> : vector<8xf32>
    %19 = vector.multi_reduction <add>, %18, %cst_12 [1] : vector<8x128xf32> to vector<8xf32>
    %20 = vector.shape_cast %19 : vector<8xf32> to vector<8x1xf32>
    %21 = math.rsqrt %20 : vector<8x1xf32>
    %22 = vector.broadcast %21 : vector<8x1xf32> to vector<8x128xf32>
    %23 = arith.mulf %17, %22 : vector<8x128xf32>
    %c0_13 = arith.constant 0 : index
    %c0_14 = arith.constant 0 : index
    %24 = vector.load %arg6[%c0_13, %c0_14] : memref<8x128xf32, #tpu.memory_space<vmem>>, vector<8x128xf32>
    tpu.vector_store %arg6[%c0_13, %c0_14], %23 {strides = array<i32>} : memref<8x128xf32, #tpu.memory_space<vmem>>, vector<8x128xf32>,
    %25 = arith.truncf %11 : vector<8x128xf32> to vector<8x128xbf16>
    %c0_15 = arith.constant 0 : index
    %c0_16 = arith.constant 0 : index
    %26 = vector.load %arg7[%c0_15, %c0_16] : memref<8x128xbf16, #tpu.memory_space<vmem>>, vector<8x128xbf16>
    tpu.vector_store %arg7[%c0_15, %c0_16], %25 {strides = array<i32>} : memref<8x128xbf16, #tpu.memory_space<vmem>>, vector<8x128xbf16>,
    return
  }
  func.func @transform_0(%arg0: i32) -> (i32, i32) {
    %c0_i32 = arith.constant 0 : i32
    %c0_i32_0 = arith.constant 0 : i32
    return %arg0, %c0_i32 : i32, i32
  }
  func.func @transform_1(%arg0: i32) -> (i32, i32) {
    %c0_i32 = arith.constant 0 : i32
    %c0_i32_0 = arith.constant 0 : i32
    %c0_i32_1 = arith.constant 0 : i32
    return %c0_i32, %c0_i32_0 : i32, i32
  }
  func.func @transform_2(%arg0: i32) -> (i32, i32) {
    %c0_i32 = arith.constant 0 : i32
    %c0_i32_0 = arith.constant 0 : i32
    %c0_i32_1 = arith.constant 0 : i32
    return %c0_i32, %c0_i32_0 : i32, i32
  }
  func.func @transform_3(%arg0: i32) -> (i32, i32) {
    %c0_i32 = arith.constant 0 : i32
    %c0_i32_0 = arith.constant 0 : i32
    %c0_i32_1 = arith.constant 0 : i32
    return %c0_i32, %c0_i32_0 : i32, i32
  }
  func.func @transform_4(%arg0: i32) -> (i32, i32) {
    %c0_i32 = arith.constant 0 : i32
    %c0_i32_0 = arith.constant 0 : i32
    %c0_i32_1 = arith.constant 0 : i32
    return %c0_i32, %c0_i32_0 : i32, i32
  }
  func.func @transform_5(%arg0: i32) -> (i32, i32) {
    %c0_i32 = arith.constant 0 : i32
    %c0_i32_0 = arith.constant 0 : i32
    return %arg0, %c0_i32 : i32, i32
  }
  func.func @transform_6(%arg0: i32) -> (i32, i32) {
    %c0_i32 = arith.constant 0 : i32
    %c0_i32_0 = arith.constant 0 : i32
    return %arg0, %c0_i32 : i32, i32
  }
}

</mosaic_0001>

<bundles_post_ra>
// kernel: tpu_custom_call.1
= control target key start
LH: loop header
LB: loop body
LE: loop exit
PB: predicated region body
PF: predicated region fallthrough
CT: control target
= control target key end

     0   :  { %12 = vsyncpa [#allocation3], 0  ;;  %s605_s0 = inlined_call_operand.hbm [shape: f32[8,128], index: 0, kind: input, shape index: {}]   ;;  %s606_s1 = inlined_call_operand.hbm [shape: bf16[128,128], index: 1, kind: input, shape index: {}]   ;;  %s607_s2 = inlined_call_operand.vmem [shape: f32[1,128], index: 2, kind: input, shape index: {}]   ;;  %s608_s3 = inlined_call_operand.hbm [shape: bf16[128,128], index: 3, kind: input, shape index: {}]   ;;  %s609_s4 = inlined_call_operand.vmem [shape: f32[1,128], index: 4, kind: input, shape index: {}]   ;;  %s610_s5 = inlined_call_operand.hbm [shape: f32[8,128], index: 5, kind: output, shape index: {0}]   ;;  %s611_s6 = inlined_call_operand.hbm [shape: bf16[8,128], index: 6, kind: output, shape index: {1}]  }
   0x1   :  { %13 = vsyncpa [#allocation6], 0 }
   0x2   :  { %14 = vsyncpa [#allocation4], 0 }
   0x3   :  { %15 = vsyncpa [#allocation10], 0  ;;  %s540_s21 = smov [#allocation5]  }
   0x4   :  { %s31_s22 = sshll.u32 %s540_s21, 4  ;;  %s32_s22 = int_to_ptr.vmem [resolvable:$true] %s31_s22 }
   0x5   :  { %s440_s23 = scalar_lea.vmem %s32_s22, 1024  ;;  %p445_p1 = scmp.lt.s32.totalorder %s32_s22, %s32_s22 }
   0x6   :  { %p441_p0 = scmp.ne.s32.totalorder %s32_s22, %s440_s23  ;;  %p446_p2 = scmp.lt.s32.totalorder %s440_s23, %s440_s23 }
   0x8   :  { %p447_p3 = por %p446_p2, %p445_p1 }
   0xa   :  { %p448_p4 = pnand %p447_p3, %p441_p0 }
   0xc   :  { %451 = shalt.err (!%p448_p4)
}
   0xd   :  { %s541_s24 = smov 64   ;;  %s542_s25 = smov 4  }
   0xe   :  { %37 = dma.hbm_to_vmem [thread:$0]  %s606_s1, 1024, %s32_s22, [#allocation6], %s541_s24, %s541_s24, %s542_s25  }
   0xf   :  { %s543_s28 = smov [#allocation2]   ;;  %s544_s30 = smov [#allocation7]  }
  0x10   :  { %s22_s29 = sshll.u32 %s543_s28, 4  ;;  %s45_s7 = sshll.u32 %s544_s30, 4  ;;  %s23_s29 = int_to_ptr.vmem [resolvable:$true] %s22_s29  ;;  %s46_s7 = int_to_ptr.vmem [resolvable:$true] %s45_s7 }
  0x11   :  { %s460_s8 = scalar_lea.vmem %s23_s29, 128  ;;  %p465_p6 = scmp.lt.s32.totalorder %s23_s29, %s23_s29 }
  0x12   :  { %p461_p5 = scmp.ne.s32.totalorder %s23_s29, %s460_s8  ;;  %p466_p7 = scmp.lt.s32.totalorder %s460_s8, %s460_s8 }
  0x14   :  { %p467_p8 = por %p466_p7, %p465_p6 }
  0x16   :  { %p468_p9 = pnand %p467_p8, %p461_p5 }
  0x18   :  { %471 = shalt.err (!%p468_p9)
}
  0x19   :  { %25 = dma.hbm_to_vmem [thread:$0]  %s605_s0, 128, %s23_s29, [#allocation3]  }
  0x1a   :  { %s480_s11 = scalar_lea.vmem %s46_s7, 1024  ;;  %p485_p11 = scmp.lt.s32.totalorder %s46_s7, %s46_s7 }
  0x1b   :  { %p481_p10 = scmp.ne.s32.totalorder %s46_s7, %s480_s11  ;;  %p486_p12 = scmp.lt.s32.totalorder %s480_s11, %s480_s11 }
  0x1d   :  { %p487_p13 = por %p486_p12, %p485_p11 }
  0x1f   :  { %p488_p0 = pnand %p487_p13, %p481_p10 }
  0x21   :  { %491 = shalt.err (!%p488_p0)
}
  0x22   :  { %51 = dma.hbm_to_vmem [thread:$0]  %s608_s3, 1024, %s46_s7, [#allocation6], %s541_s24, %s541_s24, %s542_s25  }
  0x23   :  { %532 = dma.done.wait [#allocation3], 128  }
  0x24   :  { %533 = vsyncadd [#allocation3], 4294967168 }
  0x25   :  { %534 = dma.done.wait [#allocation6], 2048  }
  0x26   :  { %535 = vsyncadd [#allocation6], 4294965248  ;;  %v545_v0 = vmov 0.0   ;;  %vm546_vm0 = vmmov 0   ;;  %v414_v1 = vld [vmem:[#allocation5 + $0x38] sm:$0xff]   ;;  %v415_v2 = vld [vmem:[#allocation5 + $0x30] sm:$0xff]  }
  0x27   :  { %365 = vmatprep.subr.bf16.mxu0 %v545_v0  ;;  %381 = vmatprep.mubr.msk.bf16.mxu0 %vm546_vm0, %v545_v0  ;;  %v416_v3 = vld [vmem:[#allocation5 + $0x28] sm:$0xff]   ;;  %v422_v4 = vld [vmem:[#allocation7 + $0x38] sm:$0xff]   ;;  %v417_v5 = vld [vmem:[#allocation5 + $0x20] sm:$0xff]  }
  0x28   :  { %385 = vmatprep.subr.bf16.mxu1 %v545_v0  ;;  %401 = vmatprep.mubr.msk.bf16.mxu1 %vm546_vm0, %v545_v0  ;;  %v423_v6 = vld [vmem:[#allocation7 + $0x30] sm:$0xff]   ;;  %v418_v7 = vld [vmem:[#allocation5 + $0x18] sm:$0xff]   ;;  %v424_v8 = vld [vmem:[#allocation7 + $0x28] sm:$0xff]  }
  0x29   :  { %366 = vmatpush3.bf16.msra.mxu0 %v414_v1  ;;  %386 = vmatpush3.bf16.msra.mxu1 %v422_v4  ;;  %v419_v9 = vld [vmem:[#allocation5 + $0x10] sm:$0xff]   ;;  %v425_v10 = vld [vmem:[#allocation7 + $0x20] sm:$0xff]   ;;  %v420_v11 = vld [vmem:[#allocation5 + $0x8] sm:$0xff]  }
  0x2a   :  { %367 = vmatprep.subr.bf16.mxu0 %v545_v0  ;;  %387 = vmatprep.subr.bf16.mxu1 %v545_v0  ;;  %v426_v12 = vld [vmem:[#allocation7 + $0x18] sm:$0xff]   ;;  %v421_v13 = vld [vmem:[#allocation5] sm:$0xff]   ;;  %v427_v15 = vld [vmem:[#allocation7 + $0x10] sm:$0xff]  }
  0x2b   :  { %v64_v14 = vld [vmem:[#allocation2] sm:$0xff]  ;;  %v428_v17 = vld [vmem:[#allocation7 + $0x8] sm:$0xff]   ;;  %v429_v18 = vld [vmem:[#allocation7] sm:$0xff]  }
  0x2c   :  { %v65_v16 = vpack.c.bf16 %v64_v14, %v64_v14  ;;  %v329_v19 = vld [vmem:[%s607_s2] ss:$0 sm:$0xff]  ;;  %s547_s2 = smov [#allocation9]  }
  0x2d   :  { %368 = vmatpush3.bf16.msra.mxu0 %v415_v2  ;;  %388 = vmatpush3.bf16.msra.mxu1 %v423_v6  ;;  %v338_v28 = vld [vmem:[%s609_s4] ss:$0 sm:$0xff]  ;;  %s315_s15 = sshll.u32 %s547_s2, 4  ;;  %s316_s15 = int_to_ptr.vmem [resolvable:$true] %s315_s15 }
  0x2e   :  { %369 = vmatprep.subr.bf16.mxu0 %v545_v0  ;;  %389 = vmatprep.subr.bf16.mxu1 %v545_v0  ;;  %s492_s16 = scalar_lea.vmem %s316_s15, 64  ;;  %p497_p2 = scmp.lt.s32.totalorder %s316_s15, %s316_s15 }
  0x2f   :  { %p493_p1 = scmp.ne.s32.totalorder %s316_s15, %s492_s16  ;;  %p498_p3 = scmp.lt.s32.totalorder %s492_s16, %s492_s16 }
  0x31   :  { %370 = vmatpush3.bf16.msra.mxu0 %v416_v3  ;;  %390 = vmatpush3.bf16.msra.mxu1 %v424_v8  ;;  %p499_p4 = por %p498_p3, %p497_p2 }
  0x32   :  { %371 = vmatprep.subr.bf16.mxu0 %v545_v0  ;;  %391 = vmatprep.subr.bf16.mxu1 %v545_v0 }
  0x33   :  { %p500_p5 = pnand %p499_p4, %p493_p1 }
  0x35   :  { %372 = vmatpush3.bf16.msra.mxu0 %v417_v5  ;;  %392 = vmatpush3.bf16.msra.mxu1 %v425_v10 }
  0x36   :  { %373 = vmatprep.subr.bf16.mxu0 %v545_v0  ;;  %393 = vmatprep.subr.bf16.mxu1 %v545_v0 }
  0x39   :  { %374 = vmatpush3.bf16.msra.mxu0 %v418_v7  ;;  %394 = vmatpush3.bf16.msra.mxu1 %v426_v12 }
  0x3a   :  { %375 = vmatprep.subr.bf16.mxu0 %v545_v0  ;;  %395 = vmatprep.subr.bf16.mxu1 %v545_v0 }
  0x3d   :  { %376 = vmatpush3.bf16.msra.mxu0 %v419_v9  ;;  %396 = vmatpush3.bf16.msra.mxu1 %v427_v15 }
  0x3e   :  { %377 = vmatprep.subr.bf16.mxu0 %v545_v0  ;;  %397 = vmatprep.subr.bf16.mxu1 %v545_v0 }
  0x41   :  { %378 = vmatpush3.bf16.msra.mxu0 %v420_v11  ;;  %398 = vmatpush3.bf16.msra.mxu1 %v428_v17 }
  0x42   :  { %379 = vmatprep.subr.bf16.mxu0 %v545_v0  ;;  %399 = vmatprep.subr.bf16.mxu1 %v545_v0 }
  0x45   :  { %380 = vmatpush3.bf16.msra.mxu0 %v421_v13  ;;  %400 = vmatpush3.bf16.msra.mxu1 %v429_v18 }
  0x48   :  { %382 = vmatmul.mubr.bf16.vlgmr.msra.gmra.mxu0 %v65_v16 }
 0x108   :  { %v171_v20 = vpop.f32.mrf.mxu0 }
 0x109   :  { %v172_v21 = vadd.f32 %v329_v19, %v171_v20 }
 0x10a   :  { %v383_v22 = vpop.f32.mrf.mxu0 }
 0x10b   :  { %vm177_vm1 = vcmp.gt.f32.partialorder %v172_v21, 0.0  ;;  %v178_v23 = vmul.f32 0.2, %v172_v21 }
 0x10c   :  { %v174_v24 = vpop.f32.mrf.mxu0 }
 0x10d   :  { %v179_v25 = vsel %vm177_vm1, %v172_v21, %v178_v23 }
 0x10e   :  { %v384_v26 = vpop.f32.mrf.mxu0  ;;  %v180_v27 = vpack.c.bf16 %v179_v25, %v179_v25 }
 0x110   :  { %402 = vmatmul.mubr.bf16.vlgmr.msra.gmra.mxu1 %v180_v27  ;;  %298 = vst [vmem:[#allocation9] sm:$0xf] %v180_v27 }
 0x1d0   :  { %v286_v29 = vpop.f32.mrf.mxu1 }
 0x1d1   :  { %v287_v30 = vadd.f32 %v338_v28, %v286_v29 }
 0x1d2   :  { %v403_v31 = vpop.f32.mrf.mxu1 }
 0x1d3   :  { %v292_v32 = vmul.f32 %v287_v30, %v287_v30 }
 0x1d4   :  { %v289_v33 = vpop.f32.mrf.mxu1 }
 0x1d5   :  { %293 = vadd.xlane.f32.xlu0 %v292_v32 }
 0x1d6   :  { %v404_v34 = vpop.f32.mrf.mxu1 }
 0x1d7   :  { %503 = shalt.err (!%p500_p5)
}
 0x1d8   :  { %318 = dma.vmem_to_hbm [thread:$0]  %s316_s15, 64, %s611_s6, [#allocation10]  }
 0x1d9   :  { %s548_s4 = smov [#allocation8]  }
 0x1da   :  { %s305_s19 = sshll.u32 %s548_s4, 4  ;;  %s306_s19 = int_to_ptr.vmem [resolvable:$true] %s305_s19 }
 0x1db   :  { %s512_s20 = scalar_lea.vmem %s306_s19, 128  ;;  %p517_p7 = scmp.lt.s32.totalorder %s306_s19, %s306_s19 }
 0x1dc   :  { %p513_p6 = scmp.ne.s32.totalorder %s306_s19, %s512_s20  ;;  %p518_p8 = scmp.lt.s32.totalorder %s512_s20, %s512_s20 }
 0x1de   :  { %p519_p9 = por %p518_p8, %p517_p7 }
 0x1e0   :  { %p520_p10 = pnand %p519_p9, %p513_p6 }
 0x25e   :  { %v294_v35 = vpop.xlane.xlu0 %293 }
 0x25f   :  { %430 = vrsqrt.f32 %v294_v35 }
 0x26c   :  { %v431_v36 = vpop.eup %430 }
 0x26d   :  { %v296_v37 = vmul.f32 %v431_v36, %v287_v30 }
 0x26f   :  { %297 = vst [vmem:[#allocation8] sm:$0xff] %v296_v37 }
 0x270   :  { %523 = shalt.err (!%p520_p10)
}
 0x271   :  { %308 = dma.vmem_to_hbm [thread:$0]  %s306_s19, 128, %s610_s5, [#allocation4]  }
 0x272   :  { %536 = dma.done.wait [#allocation4], 128  }
 0x273   :  { %537 = vsyncadd [#allocation4], 4294967168 }
 0x274   :  { %538 = dma.done.wait [#allocation10], 64  }
 0x275   :  { %539 = vsyncadd [#allocation10], 4294967232 }
 0x276   :  { %325 = vsyncpa [#allocation3], 1 }
 0x277   :  { %326 = vsyncpa [#allocation6], 1 }
 0x278   :  { %327 = vsyncpa [#allocation4], 1 }
 0x279   :  { %328 = vsyncpa [#allocation10], 1 }

</bundles_post_ra>
